<compile_context>
chip_gen: v7x
topology: tpu7x:2x2x1
jax: 0.10.0
libtpu: 0.0.40
codegen_flags: <defaults>
</compile_context>

<pallas_src>
import functools

import jax
import jax.numpy as jnp
from jax import lax
from jax.experimental import pallas as pl
from jax.experimental.pallas import tpu as pltpu


def _lstm_cell(gates_x, h, c, whh, hidden_size, mm_dtype):
    """One LSTM step. gates_x: (bb, 4H) f32 precomputed x-projection (+bias)."""
    H = hidden_size
    # TODO(synk): whh is loop-invariant; pltpu.matmul_push_rhs/acc_lhs/pop could hold
    # it resident in MXU weight staging across the recurrence (avoids per-step RHS
    # re-push); omitted to keep lowering portable across v5e/v6e/v7x.
    gates = gates_x + jnp.dot(
        h.astype(mm_dtype), whh, preferred_element_type=jnp.float32
    )
    # Gate column order is (i, f, o, g): one wide EUP sigmoid pass + one tanh pass.
    sig = jax.nn.sigmoid(gates[:, : 3 * H])
    i_g = sig[:, 0 * H:1 * H]
    f_g = sig[:, 1 * H:2 * H]
    o_g = sig[:, 2 * H:3 * H]
    g_g = jnp.tanh(gates[:, 3 * H:])
    c = f_g * c + i_g * g_g
    h = o_g * jnp.tanh(c)
    return h, c


def _lstm_kernel_unrolled(x_ref, wih_ref, whh_ref, b_ref, out_ref, *,
                          seq_len, hidden_size, group, mm_dtype):
    """Small-T path: fully unrolled recurrence, lane-dense (bb, T*H) output block."""
    T, H = seq_len, hidden_size
    _, bb, I = x_ref.shape            # x block: (T, bb, I), time-major

    # Prologue: hoisted input projection for all timesteps, one MXU pass + fused bias.
    gx = jnp.dot(
        x_ref[...].reshape(T * bb, I).astype(mm_dtype),
        wih_ref[...],
        preferred_element_type=jnp.float32,
    ) + b_ref[...]
    gx = gx.reshape(T, bb, 4 * H)     # free split of the leading (untiled) dim

    whh = whh_ref[...]                # (H, 4H), loop-invariant (small for toy H)

    h = jnp.zeros((bb, H), jnp.float32)
    c = jnp.zeros((bb, H), jnp.float32)

    # Serial recurrence, fully unrolled (T is small and static). `group` consecutive
    # h_t are packed into one 128-lane tile so each store is an unmasked vst.
    for g0 in range(T // group):
        hs = []
        for u in range(group):
            h, c = _lstm_cell(gx[g0 * group + u], h, c, whh, H, mm_dtype)
            hs.append(h)
        blk = hs[0] if group == 1 else jnp.concatenate(hs, axis=1)
        out_ref[:, g0 * group * H:(g0 + 1) * group * H] = blk.astype(out_ref.dtype)


def _lstm_kernel_looped(x_ref, wih_ref, whh_ref, b_ref, out_ref, gx_ref, *,
                        seq_len, hidden_size, unroll, mm_dtype):
    """Non-toy-T path: fori_loop recurrence, hoisted projection parked in VMEM scratch."""
    T, H = seq_len, hidden_size
    _, bb, I = x_ref.shape            # x block: (T, bb, I), time-major

    gx_ref[...] = (
        jnp.dot(
            x_ref[...].reshape(T * bb, I).astype(mm_dtype),
            wih_ref[...],
            preferred_element_type=jnp.float32,
        ) + b_ref[...]
    ).reshape(T, bb, 4 * H)

    def body(t, carry):
        h, c = carry
        whh = whh_ref[...]            # per-step load: bounded live range for large H
        h, c = _lstm_cell(gx_ref[t], h, c, whh, H, mm_dtype)
        out_ref[t] = h.astype(out_ref.dtype)
        return (h, c)

    h0 = jnp.zeros((bb, H), jnp.float32)
    c0 = jnp.zeros((bb, H), jnp.float32)
    lax.fori_loop(0, T, body, (h0, c0), unroll=unroll)


def _num_tensorcores():
    """Best-effort TensorCore count of the local device (v5e/v6e: 1, v7x: 2)."""
    try:
        d = jax.devices()[0]
        if d.platform != "tpu":
            return 1
        n = getattr(d, "num_cores", None)
        if isinstance(n, int) and n > 0:
            return n
        return 2 if "v7" in str(getattr(d, "device_kind", "")).lower() else 1
    except Exception:
        return 1


def rnn_basic_block_forward(x, params, *, matmul_dtype=jnp.bfloat16,
                            max_unrolled_seq_len=16):
    """RNNBasicBlock (LSTM, dropout_rate=None) forward.

    x: (B, T, input_size) float32 -> (B, T, hidden_size) float32.
    params = (w_ih, w_hh, b_ih, b_hh) in torch layout:
        w_ih (4H, I), w_hh (4H, H), b_ih (4H,), b_hh (4H,), gate order (i, f, g, o).
    matmul_dtype: dtype of the MXU operands only (weights / x / h); state, gates and
        nonlinearities stay f32 regardless (no recurrent drift).
    """
    w_ih, w_hh, b_ih, b_hh = params
    B, T, I = x.shape
    H = w_hh.shape[1]

    # Torch gate order (i, f, g, o) -> (i, f, o, g): sigmoid gates become contiguous.
    def permute_gates(a):
        i, f, g, o = jnp.split(a, 4, axis=0)
        return jnp.concatenate([i, f, o, g], axis=0)

    wih = jnp.transpose(permute_gates(w_ih), (1, 0)).astype(matmul_dtype)    # (I, 4H)
    whh = jnp.transpose(permute_gates(w_hh), (1, 0)).astype(matmul_dtype)    # (H, 4H)
    bias = permute_gates(b_ih + b_hh).astype(jnp.float32).reshape(1, 4 * H)  # (1, 4H)

    # Time-major input so the kernel indexes step t on a leading (untiled) axis.
    # One tiny single-pass XLA transpose in the wrapper; output stays batch-major.
    x_tm = jnp.transpose(x, (1, 0, 2))   # (T, B, I)

    # Split the batch over grid steps only where it buys parallelism (2 TCs on v7x,
    # with sublane-aligned halves). On single-TC v5e/v6e keep grid=(1,).
    nb = 2 if (_num_tensorcores() >= 2 and B % 16 == 0) else 1
    bb = B // nb

    x_spec = pl.BlockSpec((T, bb, I), lambda b: (0, b, 0))
    weight_specs = [
        pl.BlockSpec((I, 4 * H), lambda b: (0, 0)),   # W_ih^T (grid-invariant)
        pl.BlockSpec((H, 4 * H), lambda b: (0, 0)),   # W_hh^T (grid-invariant)
        pl.BlockSpec((1, 4 * H), lambda b: (0, 0)),   # combined bias
    ]
    # TODO(synk): on v7x (64 MiB VMEM) single-buffer these grid-invariant weights
    # (pipeline_mode=pl.Buffered(1)) and set vmem_limit_bytes explicitly when H scales.
    compiler_params = pltpu.CompilerParams(dimension_semantics=("parallel",))

    if T <= max_unrolled_seq_len:
        # Fully unrolled recurrence; resident lane-dense (bb, T*H) output block.
        if H % 128 == 0:
            group = 1                         # each per-step store already 128-lane wide
        elif 128 % H == 0 and T % (128 // H) == 0:
            group = 128 // H                  # pack h_t's into (bb, 128) unmasked stores
        else:
            group = 1                         # fallback: masked narrow stores
        kernel = functools.partial(
            _lstm_kernel_unrolled, seq_len=T, hidden_size=H, group=group,
            mm_dtype=matmul_dtype)
        out_flat = pl.pallas_call(
            kernel,
            out_shape=jax.ShapeDtypeStruct((B, T * H), x.dtype),
            grid_spec=pltpu.PrefetchScalarGridSpec(
                num_scalar_prefetch=0,
                grid=(nb,),
                in_specs=[x_spec] + weight_specs,
                out_specs=pl.BlockSpec((bb, T * H), lambda b: (b, 0)),
            ),
            compiler_params=compiler_params,
        )(x_tm, wih, whh, bias)
        # (B, T*H) -> (B, T, H): free row-major reshape (out[b, t*H + j] == h_t[b, j]).
        return out_flat.reshape(B, T, H)

    # Non-toy T: fori_loop recurrence with the projection in a VMEM scratch.
    # TODO(synk): for very long T / large I on v7x, stream the prologue projection in
    # T-chunks (memory_space=pl.ANY + pltpu.emit_pipeline) instead of holding the full
    # (T, bb, I) input block and (T, bb, 4H) scratch resident.
    kernel = functools.partial(
        _lstm_kernel_looped, seq_len=T, hidden_size=H,
        unroll=min(4, T), mm_dtype=matmul_dtype)
    out_tm = pl.pallas_call(
        kernel,
        out_shape=jax.ShapeDtypeStruct((T, B, H), x.dtype),
        grid_spec=pltpu.PrefetchScalarGridSpec(
            num_scalar_prefetch=0,
            grid=(nb,),
            in_specs=[x_spec] + weight_specs,
            out_specs=pl.BlockSpec((T, bb, H), lambda b: (0, b, 0)),
            scratch_shapes=[pltpu.VMEM((T, bb, 4 * H), jnp.float32)],
        ),
        compiler_params=compiler_params,
    )(x_tm, wih, whh, bias)
    return jnp.transpose(out_tm, (1, 0, 2))


def _lstm_reference(x, params):
    """Pure-JAX reference identical to torch.nn.LSTM(batch_first=True) forward."""
    w_ih, w_hh, b_ih, b_hh = params
    H = w_hh.shape[1]
    B = x.shape[0]

    def step(carry, x_t):
        h, c = carry
        gates = x_t @ w_ih.T + h @ w_hh.T + b_ih + b_hh
        i = jax.nn.sigmoid(gates[:, 0 * H:1 * H])
        f = jax.nn.sigmoid(gates[:, 1 * H:2 * H])
        g = jnp.tanh(gates[:, 2 * H:3 * H])
        o = jax.nn.sigmoid(gates[:, 3 * H:4 * H])
        c = f * c + i * g
        h = o * jnp.tanh(c)
        return (h, c), h

    init = (jnp.zeros((B, H), jnp.float32), jnp.zeros((B, H), jnp.float32))
    _, hs = lax.scan(step, init, jnp.transpose(x, (1, 0, 2)))
    return jnp.transpose(hs, (1, 0, 2))


if __name__ == "__main__":
    # Small shapes consistent with the module: batch=2, seq=8, input_size=4, hidden=32.
    B, T, I, H = 2, 8, 4, 32
    key = jax.random.PRNGKey(0)
    kx, k1, k2, k3, k4 = jax.random.split(key, 5)

    # Deterministic PyTorch-style parameter init: U(-1/sqrt(H), 1/sqrt(H)).
    bound = 1.0 / jnp.sqrt(jnp.float32(H))
    w_ih = jax.random.uniform(k1, (4 * H, I), jnp.float32, -bound, bound)
    w_hh = jax.random.uniform(k2, (4 * H, H), jnp.float32, -bound, bound)
    b_ih = jax.random.uniform(k3, (4 * H,), jnp.float32, -bound, bound)
    b_hh = jax.random.uniform(k4, (4 * H,), jnp.float32, -bound, bound)
    params = (w_ih, w_hh, b_ih, b_hh)

    x = jax.random.normal(kx, (B, T, I), jnp.float32)
    ref = jax.block_until_ready(_lstm_reference(x, params))

    # 1) f32 matmul operands, unrolled path: tight structural/numerical check.
    out_f32 = jax.block_until_ready(
        rnn_basic_block_forward(x, params, matmul_dtype=jnp.float32))
    assert out_f32.shape == (B, T, H)
    assert jnp.allclose(out_f32, ref, atol=1e-4, rtol=1e-4), "f32 unrolled path mismatch"

    # 2) Default config: bf16 MXU operands, f32 state/gates/accumulation.
    out_bf16 = jax.block_until_ready(rnn_basic_block_forward(x, params))
    assert out_bf16.shape == (B, T, H)
    assert jnp.allclose(out_bf16, ref, atol=2e-2, rtol=2e-2), "bf16 unrolled path mismatch"

    # 3) fori_loop + VMEM-scratch path (used automatically for non-toy T), forced here.
    out_loop = jax.block_until_ready(
        rnn_basic_block_forward(x, params, matmul_dtype=jnp.float32,
                                max_unrolled_seq_len=0))
    assert jnp.allclose(out_loop, ref, atol=1e-4, rtol=1e-4), "fori_loop path mismatch"

    # TODO(synk): dropout_rate=None in this config; a training-mode Dropout would use
    # pltpu.prng_seed + pltpu.prng_random_bits (eval-mode identity otherwise).
    print("KERNEL_OK")
</pallas_src>

<mosaic_0001>
module attributes {stable_mosaic.version = 11 : i64} {
  func.func @_lstm_kernel_unrolled(%arg0: i32, %arg1: memref<8x2x4xf32, #tpu.memory_space<vmem>>, %arg2: memref<4x128xf32, #tpu.memory_space<vmem>>, %arg3: memref<32x128xf32, #tpu.memory_space<vmem>>, %arg4: memref<1x128xf32, #tpu.memory_space<vmem>>, %arg5: memref<2x256xf32, #tpu.memory_space<vmem>>) attributes {dimension_semantics = [#tpu.dimension_semantics<parallel>], iteration_bounds = array<i64: 1>, scalar_prefetch = 0 : i64, scratch_operands = 0 : i64, tpu.core_type = #tpu.core_type<tc>, window_params = [{transform_indices = @transform_0, window_bounds = array<i64: 8, 2, 4>}, {pipeline_mode = #tpu.pipeline_mode<synchronous>, transform_indices = @transform_1, window_bounds = array<i64: 4, 128>}, {pipeline_mode = #tpu.pipeline_mode<synchronous>, transform_indices = @transform_2, window_bounds = array<i64: 32, 128>}, {pipeline_mode = #tpu.pipeline_mode<synchronous>, transform_indices = @transform_3, window_bounds = array<i64: 1, 128>}, {transform_indices = @transform_4, window_bounds = array<i64: 2, 256>}]} {
    %c0 = arith.constant 0 : index
    %c0_0 = arith.constant 0 : index
    %c0_1 = arith.constant 0 : index
    %0 = vector.load %arg1[%c0, %c0_0, %c0_1] : memref<8x2x4xf32, #tpu.memory_space<vmem>>, vector<8x2x4xf32>
    %1 = vector.shape_cast %0 : vector<8x2x4xf32> to vector<16x4xf32>
    %c0_2 = arith.constant 0 : index
    %c0_3 = arith.constant 0 : index
    %2 = vector.load %arg2[%c0_2, %c0_3] : memref<4x128xf32, #tpu.memory_space<vmem>>, vector<4x128xf32>
    %cst = arith.constant dense<0.000000e+00> : vector<16x128xf32>
    %3 = tpu.matmul %1, %2, %cst {dimension_numbers = #tpu.dot_dimension_numbers<[1], [0], [0], [1], [0, 0, 1, 1], [], []>} : vector<16x4xf32>, vector<4x128xf32>, vector<16x128xf32> -> vector<16x128xf32>
    %c0_4 = arith.constant 0 : index
    %c0_5 = arith.constant 0 : index
    %4 = vector.load %arg4[%c0_4, %c0_5] : memref<1x128xf32, #tpu.memory_space<vmem>>, vector<1x128xf32>
    %5 = vector.broadcast %4 : vector<1x128xf32> to vector<16x128xf32>
    %6 = arith.addf %3, %5 : vector<16x128xf32>
    %7 = vector.shape_cast %6 : vector<16x128xf32> to vector<8x2x128xf32>
    %c0_6 = arith.constant 0 : index
    %c0_7 = arith.constant 0 : index
    %8 = vector.load %arg3[%c0_6, %c0_7] : memref<32x128xf32, #tpu.memory_space<vmem>>, vector<32x128xf32>
    %cst_8 = arith.constant 0.000000e+00 : f32
    %9 = vector.broadcast %cst_8 : f32 to vector<2x32xf32>
    %cst_9 = arith.constant 0.000000e+00 : f32
    %10 = vector.broadcast %cst_9 : f32 to vector<2x32xf32>
    %11 = vector.extract_strided_slice %7 {offsets = [0, 0, 0], sizes = [1, 2, 128], strides = [1, 1, 1]} : vector<8x2x128xf32> to vector<1x2x128xf32>
    %12 = vector.shape_cast %11 : vector<1x2x128xf32> to vector<2x128xf32>
    %cst_10 = arith.constant dense<0.000000e+00> : vector<2x128xf32>
    %13 = tpu.matmul %9, %8, %cst_10 {dimension_numbers = #tpu.dot_dimension_numbers<[1], [0], [0], [1], [0, 0, 1, 1], [], []>} : vector<2x32xf32>, vector<32x128xf32>, vector<2x128xf32> -> vector<2x128xf32>
    %14 = arith.addf %12, %13 : vector<2x128xf32>
    %15 = vector.extract_strided_slice %14 {offsets = [0, 0], sizes = [2, 96], strides = [1, 1]} : vector<2x128xf32> to vector<2x96xf32>
    %16 = arith.negf %15 : vector<2x96xf32>
    %17 = math.exp %16 : vector<2x96xf32>
    %cst_11 = arith.constant 1.000000e+00 : f32
    %18 = vector.broadcast %cst_11 : f32 to vector<2x96xf32>
    %19 = arith.addf %18, %17 : vector<2x96xf32>
    %20 = arith.divf %18, %19 : vector<2x96xf32>
    %21 = vector.extract_strided_slice %20 {offsets = [0, 0], sizes = [2, 32], strides = [1, 1]} : vector<2x96xf32> to vector<2x32xf32>
    %22 = vector.extract_strided_slice %20 {offsets = [0, 32], sizes = [2, 32], strides = [1, 1]} : vector<2x96xf32> to vector<2x32xf32>
    %23 = vector.extract_strided_slice %20 {offsets = [0, 64], sizes = [2, 32], strides = [1, 1]} : vector<2x96xf32> to vector<2x32xf32>
    %24 = vector.extract_strided_slice %14 {offsets = [0, 96], sizes = [2, 32], strides = [1, 1]} : vector<2x128xf32> to vector<2x32xf32>
    %25 = math.tanh %24 : vector<2x32xf32>
    %26 = arith.mulf %22, %10 : vector<2x32xf32>
    %27 = arith.mulf %21, %25 : vector<2x32xf32>
    %28 = arith.addf %26, %27 : vector<2x32xf32>
    %29 = math.tanh %28 : vector<2x32xf32>
    %30 = arith.mulf %23, %29 : vector<2x32xf32>
    %31 = vector.extract_strided_slice %7 {offsets = [1, 0, 0], sizes = [1, 2, 128], strides = [1, 1, 1]} : vector<8x2x128xf32> to vector<1x2x128xf32>
    %32 = vector.shape_cast %31 : vector<1x2x128xf32> to vector<2x128xf32>
    %cst_12 = arith.constant dense<0.000000e+00> : vector<2x128xf32>
    %33 = tpu.matmul %30, %8, %cst_12 {dimension_numbers = #tpu.dot_dimension_numbers<[1], [0], [0], [1], [0, 0, 1, 1], [], []>} : vector<2x32xf32>, vector<32x128xf32>, vector<2x128xf32> -> vector<2x128xf32>
    %34 = arith.addf %32, %33 : vector<2x128xf32>
    %35 = vector.extract_strided_slice %34 {offsets = [0, 0], sizes = [2, 96], strides = [1, 1]} : vector<2x128xf32> to vector<2x96xf32>
    %36 = arith.negf %35 : vector<2x96xf32>
    %37 = math.exp %36 : vector<2x96xf32>
    %cst_13 = arith.constant 1.000000e+00 : f32
    %38 = vector.broadcast %cst_13 : f32 to vector<2x96xf32>
    %39 = arith.addf %38, %37 : vector<2x96xf32>
    %40 = arith.divf %38, %39 : vector<2x96xf32>
    %41 = vector.extract_strided_slice %40 {offsets = [0, 0], sizes = [2, 32], strides = [1, 1]} : vector<2x96xf32> to vector<2x32xf32>
    %42 = vector.extract_strided_slice %40 {offsets = [0, 32], sizes = [2, 32], strides = [1, 1]} : vector<2x96xf32> to vector<2x32xf32>
    %43 = vector.extract_strided_slice %40 {offsets = [0, 64], sizes = [2, 32], strides = [1, 1]} : vector<2x96xf32> to vector<2x32xf32>
    %44 = vector.extract_strided_slice %34 {offsets = [0, 96], sizes = [2, 32], strides = [1, 1]} : vector<2x128xf32> to vector<2x32xf32>
    %45 = math.tanh %44 : vector<2x32xf32>
    %46 = arith.mulf %42, %28 : vector<2x32xf32>
    %47 = arith.mulf %41, %45 : vector<2x32xf32>
    %48 = arith.addf %46, %47 : vector<2x32xf32>
    %49 = math.tanh %48 : vector<2x32xf32>
    %50 = arith.mulf %43, %49 : vector<2x32xf32>
    %51 = vector.extract_strided_slice %7 {offsets = [2, 0, 0], sizes = [1, 2, 128], strides = [1, 1, 1]} : vector<8x2x128xf32> to vector<1x2x128xf32>
    %52 = vector.shape_cast %51 : vector<1x2x128xf32> to vector<2x128xf32>
    %cst_14 = arith.constant dense<0.000000e+00> : vector<2x128xf32>
    %53 = tpu.matmul %50, %8, %cst_14 {dimension_numbers = #tpu.dot_dimension_numbers<[1], [0], [0], [1], [0, 0, 1, 1], [], []>} : vector<2x32xf32>, vector<32x128xf32>, vector<2x128xf32> -> vector<2x128xf32>
    %54 = arith.addf %52, %53 : vector<2x128xf32>
    %55 = vector.extract_strided_slice %54 {offsets = [0, 0], sizes = [2, 96], strides = [1, 1]} : vector<2x128xf32> to vector<2x96xf32>
    %56 = arith.negf %55 : vector<2x96xf32>
    %57 = math.exp %56 : vector<2x96xf32>
    %cst_15 = arith.constant 1.000000e+00 : f32
    %58 = vector.broadcast %cst_15 : f32 to vector<2x96xf32>
    %59 = arith.addf %58, %57 : vector<2x96xf32>
    %60 = arith.divf %58, %59 : vector<2x96xf32>
    %61 = vector.extract_strided_slice %60 {offsets = [0, 0], sizes = [2, 32], strides = [1, 1]} : vector<2x96xf32> to vector<2x32xf32>
    %62 = vector.extract_strided_slice %60 {offsets = [0, 32], sizes = [2, 32], strides = [1, 1]} : vector<2x96xf32> to vector<2x32xf32>
    %63 = vector.extract_strided_slice %60 {offsets = [0, 64], sizes = [2, 32], strides = [1, 1]} : vector<2x96xf32> to vector<2x32xf32>
    %64 = vector.extract_strided_slice %54 {offsets = [0, 96], sizes = [2, 32], strides = [1, 1]} : vector<2x128xf32> to vector<2x32xf32>
    %65 = math.tanh %64 : vector<2x32xf32>
    %66 = arith.mulf %62, %48 : vector<2x32xf32>
    %67 = arith.mulf %61, %65 : vector<2x32xf32>
    %68 = arith.addf %66, %67 : vector<2x32xf32>
    %69 = math.tanh %68 : vector<2x32xf32>
    %70 = arith.mulf %63, %69 : vector<2x32xf32>
    %71 = vector.extract_strided_slice %7 {offsets = [3, 0, 0], sizes = [1, 2, 128], strides = [1, 1, 1]} : vector<8x2x128xf32> to vector<1x2x128xf32>
    %72 = vector.shape_cast %71 : vector<1x2x128xf32> to vector<2x128xf32>
    %cst_16 = arith.constant dense<0.000000e+00> : vector<2x128xf32>
    %73 = tpu.matmul %70, %8, %cst_16 {dimension_numbers = #tpu.dot_dimension_numbers<[1], [0], [0], [1], [0, 0, 1, 1], [], []>} : vector<2x32xf32>, vector<32x128xf32>, vector<2x128xf32> -> vector<2x128xf32>
    %74 = arith.addf %72, %73 : vector<2x128xf32>
    %75 = vector.extract_strided_slice %74 {offsets = [0, 0], sizes = [2, 96], strides = [1, 1]} : vector<2x128xf32> to vector<2x96xf32>
    %76 = arith.negf %75 : vector<2x96xf32>
    %77 = math.exp %76 : vector<2x96xf32>
    %cst_17 = arith.constant 1.000000e+00 : f32
    %78 = vector.broadcast %cst_17 : f32 to vector<2x96xf32>
    %79 = arith.addf %78, %77 : vector<2x96xf32>
    %80 = arith.divf %78, %79 : vector<2x96xf32>
    %81 = vector.extract_strided_slice %80 {offsets = [0, 0], sizes = [2, 32], strides = [1, 1]} : vector<2x96xf32> to vector<2x32xf32>
    %82 = vector.extract_strided_slice %80 {offsets = [0, 32], sizes = [2, 32], strides = [1, 1]} : vector<2x96xf32> to vector<2x32xf32>
    %83 = vector.extract_strided_slice %80 {offsets = [0, 64], sizes = [2, 32], strides = [1, 1]} : vector<2x96xf32> to vector<2x32xf32>
    %84 = vector.extract_strided_slice %74 {offsets = [0, 96], sizes = [2, 32], strides = [1, 1]} : vector<2x128xf32> to vector<2x32xf32>
    %85 = math.tanh %84 : vector<2x32xf32>
    %86 = arith.mulf %82, %68 : vector<2x32xf32>
    %87 = arith.mulf %81, %85 : vector<2x32xf32>
    %88 = arith.addf %86, %87 : vector<2x32xf32>
    %89 = math.tanh %88 : vector<2x32xf32>
    %90 = arith.mulf %83, %89 : vector<2x32xf32>
    %91 = tpu.concatenate %30, %50, %70, %90 in 1 : vector<2x32xf32>, vector<2x32xf32>, vector<2x32xf32>, vector<2x32xf32> -> vector<2x128xf32>
    %c0_18 = arith.constant 0 : index
    %c0_19 = arith.constant 0 : index
    %92 = vector.load %arg5[%c0_18, %c0_19] : memref<2x256xf32, #tpu.memory_space<vmem>>, vector<2x128xf32>
    tpu.vector_store %arg5[%c0_18, %c0_19], %91 {strides = array<i32>} : memref<2x256xf32, #tpu.memory_space<vmem>>, vector<2x128xf32>,
    %93 = vector.extract_strided_slice %7 {offsets = [4, 0, 0], sizes = [1, 2, 128], strides = [1, 1, 1]} : vector<8x2x128xf32> to vector<1x2x128xf32>
    %94 = vector.shape_cast %93 : vector<1x2x128xf32> to vector<2x128xf32>
    %cst_20 = arith.constant dense<0.000000e+00> : vector<2x128xf32>
    %95 = tpu.matmul %90, %8, %cst_20 {dimension_numbers = #tpu.dot_dimension_numbers<[1], [0], [0], [1], [0, 0, 1, 1], [], []>} : vector<2x32xf32>, vector<32x128xf32>, vector<2x128xf32> -> vector<2x128xf32>
    %96 = arith.addf %94, %95 : vector<2x128xf32>
    %97 = vector.extract_strided_slice %96 {offsets = [0, 0], sizes = [2, 96], strides = [1, 1]} : vector<2x128xf32> to vector<2x96xf32>
    %98 = arith.negf %97 : vector<2x96xf32>
    %99 = math.exp %98 : vector<2x96xf32>
    %cst_21 = arith.constant 1.000000e+00 : f32
    %100 = vector.broadcast %cst_21 : f32 to vector<2x96xf32>
    %101 = arith.addf %100, %99 : vector<2x96xf32>
    %102 = arith.divf %100, %101 : vector<2x96xf32>
    %103 = vector.extract_strided_slice %102 {offsets = [0, 0], sizes = [2, 32], strides = [1, 1]} : vector<2x96xf32> to vector<2x32xf32>
    %104 = vector.extract_strided_slice %102 {offsets = [0, 32], sizes = [2, 32], strides = [1, 1]} : vector<2x96xf32> to vector<2x32xf32>
    %105 = vector.extract_strided_slice %102 {offsets = [0, 64], sizes = [2, 32], strides = [1, 1]} : vector<2x96xf32> to vector<2x32xf32>
    %106 = vector.extract_strided_slice %96 {offsets = [0, 96], sizes = [2, 32], strides = [1, 1]} : vector<2x128xf32> to vector<2x32xf32>
    %107 = math.tanh %106 : vector<2x32xf32>
    %108 = arith.mulf %104, %88 : vector<2x32xf32>
    %109 = arith.mulf %103, %107 : vector<2x32xf32>
    %110 = arith.addf %108, %109 : vector<2x32xf32>
    %111 = math.tanh %110 : vector<2x32xf32>
    %112 = arith.mulf %105, %111 : vector<2x32xf32>
    %113 = vector.extract_strided_slice %7 {offsets = [5, 0, 0], sizes = [1, 2, 128], strides = [1, 1, 1]} : vector<8x2x128xf32> to vector<1x2x128xf32>
    %114 = vector.shape_cast %113 : vector<1x2x128xf32> to vector<2x128xf32>
    %cst_22 = arith.constant dense<0.000000e+00> : vector<2x128xf32>
    %115 = tpu.matmul %112, %8, %cst_22 {dimension_numbers = #tpu.dot_dimension_numbers<[1], [0], [0], [1], [0, 0, 1, 1], [], []>} : vector<2x32xf32>, vector<32x128xf32>, vector<2x128xf32> -> vector<2x128xf32>
    %116 = arith.addf %114, %115 : vector<2x128xf32>
    %117 = vector.extract_strided_slice %116 {offsets = [0, 0], sizes = [2, 96], strides = [1, 1]} : vector<2x128xf32> to vector<2x96xf32>
    %118 = arith.negf %117 : vector<2x96xf32>
    %119 = math.exp %118 : vector<2x96xf32>
    %cst_23 = arith.constant 1.000000e+00 : f32
    %120 = vector.broadcast %cst_23 : f32 to vector<2x96xf32>
    %121 = arith.addf %120, %119 : vector<2x96xf32>
    %122 = arith.divf %120, %121 : vector<2x96xf32>
    %123 = vector.extract_strided_slice %122 {offsets = [0, 0], sizes = [2, 32], strides = [1, 1]} : vector<2x96xf32> to vector<2x32xf32>
    %124 = vector.extract_strided_slice %122 {offsets = [0, 32], sizes = [2, 32], strides = [1, 1]} : vector<2x96xf32> to vector<2x32xf32>
    %125 = vector.extract_strided_slice %122 {offsets = [0, 64], sizes = [2, 32], strides = [1, 1]} : vector<2x96xf32> to vector<2x32xf32>
    %126 = vector.extract_strided_slice %116 {offsets = [0, 96], sizes = [2, 32], strides = [1, 1]} : vector<2x128xf32> to vector<2x32xf32>
    %127 = math.tanh %126 : vector<2x32xf32>
    %128 = arith.mulf %124, %110 : vector<2x32xf32>
    %129 = arith.mulf %123, %127 : vector<2x32xf32>
    %130 = arith.addf %128, %129 : vector<2x32xf32>
    %131 = math.tanh %130 : vector<2x32xf32>
    %132 = arith.mulf %125, %131 : vector<2x32xf32>
    %133 = vector.extract_strided_slice %7 {offsets = [6, 0, 0], sizes = [1, 2, 128], strides = [1, 1, 1]} : vector<8x2x128xf32> to vector<1x2x128xf32>
    %134 = vector.shape_cast %133 : vector<1x2x128xf32> to vector<2x128xf32>
    %cst_24 = arith.constant dense<0.000000e+00> : vector<2x128xf32>
    %135 = tpu.matmul %132, %8, %cst_24 {dimension_numbers = #tpu.dot_dimension_numbers<[1], [0], [0], [1], [0, 0, 1, 1], [], []>} : vector<2x32xf32>, vector<32x128xf32>, vector<2x128xf32> -> vector<2x128xf32>
    %136 = arith.addf %134, %135 : vector<2x128xf32>
    %137 = vector.extract_strided_slice %136 {offsets = [0, 0], sizes = [2, 96], strides = [1, 1]} : vector<2x128xf32> to vector<2x96xf32>
    %138 = arith.negf %137 : vector<2x96xf32>
    %139 = math.exp %138 : vector<2x96xf32>
    %cst_25 = arith.constant 1.000000e+00 : f32
    %140 = vector.broadcast %cst_25 : f32 to vector<2x96xf32>
    %141 = arith.addf %140, %139 : vector<2x96xf32>
    %142 = arith.divf %140, %141 : vector<2x96xf32>
    %143 = vector.extract_strided_slice %142 {offsets = [0, 0], sizes = [2, 32], strides = [1, 1]} : vector<2x96xf32> to vector<2x32xf32>
    %144 = vector.extract_strided_slice %142 {offsets = [0, 32], sizes = [2, 32], strides = [1, 1]} : vector<2x96xf32> to vector<2x32xf32>
    %145 = vector.extract_strided_slice %142 {offsets = [0, 64], sizes = [2, 32], strides = [1, 1]} : vector<2x96xf32> to vector<2x32xf32>
    %146 = vector.extract_strided_slice %136 {offsets = [0, 96], sizes = [2, 32], strides = [1, 1]} : vector<2x128xf32> to vector<2x32xf32>
    %147 = math.tanh %146 : vector<2x32xf32>
    %148 = arith.mulf %144, %130 : vector<2x32xf32>
    %149 = arith.mulf %143, %147 : vector<2x32xf32>
    %150 = arith.addf %148, %149 : vector<2x32xf32>
    %151 = math.tanh %150 : vector<2x32xf32>
    %152 = arith.mulf %145, %151 : vector<2x32xf32>
    %153 = vector.extract_strided_slice %7 {offsets = [7, 0, 0], sizes = [1, 2, 128], strides = [1, 1, 1]} : vector<8x2x128xf32> to vector<1x2x128xf32>
    %154 = vector.shape_cast %153 : vector<1x2x128xf32> to vector<2x128xf32>
    %cst_26 = arith.constant dense<0.000000e+00> : vector<2x128xf32>
    %155 = tpu.matmul %152, %8, %cst_26 {dimension_numbers = #tpu.dot_dimension_numbers<[1], [0], [0], [1], [0, 0, 1, 1], [], []>} : vector<2x32xf32>, vector<32x128xf32>, vector<2x128xf32> -> vector<2x128xf32>
    %156 = arith.addf %154, %155 : vector<2x128xf32>
    %157 = vector.extract_strided_slice %156 {offsets = [0, 0], sizes = [2, 96], strides = [1, 1]} : vector<2x128xf32> to vector<2x96xf32>
    %158 = arith.negf %157 : vector<2x96xf32>
    %159 = math.exp %158 : vector<2x96xf32>
    %cst_27 = arith.constant 1.000000e+00 : f32
    %160 = vector.broadcast %cst_27 : f32 to vector<2x96xf32>
    %161 = arith.addf %160, %159 : vector<2x96xf32>
    %162 = arith.divf %160, %161 : vector<2x96xf32>
    %163 = vector.extract_strided_slice %162 {offsets = [0, 0], sizes = [2, 32], strides = [1, 1]} : vector<2x96xf32> to vector<2x32xf32>
    %164 = vector.extract_strided_slice %162 {offsets = [0, 32], sizes = [2, 32], strides = [1, 1]} : vector<2x96xf32> to vector<2x32xf32>
    %165 = vector.extract_strided_slice %162 {offsets = [0, 64], sizes = [2, 32], strides = [1, 1]} : vector<2x96xf32> to vector<2x32xf32>
    %166 = vector.extract_strided_slice %156 {offsets = [0, 96], sizes = [2, 32], strides = [1, 1]} : vector<2x128xf32> to vector<2x32xf32>
    %167 = math.tanh %166 : vector<2x32xf32>
    %168 = arith.mulf %164, %150 : vector<2x32xf32>
    %169 = arith.mulf %163, %167 : vector<2x32xf32>
    %170 = arith.addf %168, %169 : vector<2x32xf32>
    %171 = math.tanh %170 : vector<2x32xf32>
    %172 = arith.mulf %165, %171 : vector<2x32xf32>
    %173 = tpu.concatenate %112, %132, %152, %172 in 1 : vector<2x32xf32>, vector<2x32xf32>, vector<2x32xf32>, vector<2x32xf32> -> vector<2x128xf32>
    %c0_28 = arith.constant 0 : index
    %c128 = arith.constant 128 : index
    %174 = vector.load %arg5[%c0_28, %c128] : memref<2x256xf32, #tpu.memory_space<vmem>>, vector<2x128xf32>
    tpu.vector_store %arg5[%c0_28, %c128], %173 {strides = array<i32>} : memref<2x256xf32, #tpu.memory_space<vmem>>, vector<2x128xf32>,
    return
  }
  func.func @transform_0(%arg0: i32) -> (i32, i32, i32) {
    %c0_i32 = arith.constant 0 : i32
    %c0_i32_0 = arith.constant 0 : i32
    %c0_i32_1 = arith.constant 0 : i32
    return %c0_i32, %arg0, %c0_i32_0 : i32, i32, i32
  }
  func.func @transform_1(%arg0: i32) -> (i32, i32) {
    %c0_i32 = arith.constant 0 : i32
    %c0_i32_0 = arith.constant 0 : i32
    %c0_i32_1 = arith.constant 0 : i32
    return %c0_i32, %c0_i32_0 : i32, i32
  }
  func.func @transform_2(%arg0: i32) -> (i32, i32) {
    %c0_i32 = arith.constant 0 : i32
    %c0_i32_0 = arith.constant 0 : i32
    %c0_i32_1 = arith.constant 0 : i32
    return %c0_i32, %c0_i32_0 : i32, i32
  }
  func.func @transform_3(%arg0: i32) -> (i32, i32) {
    %c0_i32 = arith.constant 0 : i32
    %c0_i32_0 = arith.constant 0 : i32
    %c0_i32_1 = arith.constant 0 : i32
    return %c0_i32, %c0_i32_0 : i32, i32
  }
  func.func @transform_4(%arg0: i32) -> (i32, i32) {
    %c0_i32 = arith.constant 0 : i32
    %c0_i32_0 = arith.constant 0 : i32
    return %arg0, %c0_i32 : i32, i32
  }
}

</mosaic_0001>

<bundles_post_ra>
// kernel: tpu_custom_call.1
= control target key start
LH: loop header
LB: loop body
LE: loop exit
PB: predicated region body
PF: predicated region fallthrough
CT: control target
= control target key end

     0   :  { %9 = vsyncpa [#allocation3], 0  ;;  %s1684_s0 = inlined_call_operand.vmem [shape: f32[8,2,4], index: 0, kind: input, shape index: {}]   ;;  %s1685_s1 = inlined_call_operand.vmem [shape: f32[4,128], index: 1, kind: input, shape index: {}]   ;;  %s1686_s2 = inlined_call_operand.hbm [shape: f32[32,128], index: 2, kind: input, shape index: {}]   ;;  %s1687_s3 = inlined_call_operand.vmem [shape: f32[1,128], index: 3, kind: input, shape index: {}]   ;;  %s1688_s4 = inlined_call_operand.hbm [shape: f32[2,256], index: 4, kind: output, shape index: {}]  }
   0x1   :  { %10 = vsyncpa [#allocation4], 0  ;;  %s1443_s15 = smov [#allocation2]   ;;  %s1395_s19 = scalar_lea.hbm %s1686_s2, 512 }
   0x2   :  { %s20_s16 = sshll.u32 %s1443_s15, 4  ;;  %p1396_p0 = scmp.ne.s32.totalorder %s1686_s2, %s1395_s19  ;;  %s21_s16 = int_to_ptr.vmem [resolvable:$true] %s20_s16 }
   0x3   :  { %p1399_p1 = scmp.lt.u32.totalorder %s1395_s19, %s1686_s2 }
   0x5   :  { %p1401_p2 = pnand %p1399_p1, %p1396_p0 }
   0x7   :  { %1404 = shalt.err (!%p1401_p2)
}
   0x8   :  { %s1405_s24 = scalar_lea.vmem %s21_s16, 512  ;;  %p1410_p4 = scmp.lt.s32.totalorder %s21_s16, %s21_s16 }
   0x9   :  { %p1406_p3 = scmp.ne.s32.totalorder %s21_s16, %s1405_s24  ;;  %p1411_p5 = scmp.lt.s32.totalorder %s1405_s24, %s1405_s24 }
   0xb   :  { %p1412_p6 = por %p1411_p5, %p1410_p4 }
   0xd   :  { %p1413_p7 = pnand %p1412_p6, %p1406_p3 }
   0xf   :  { %1416 = shalt.err (!%p1413_p7)
}
  0x10   :  { %s1444_s25 = smov 128   ;;  %s1445_s26 = smov 8  }
  0x11   :  { %26 = dma.hbm_to_vmem [thread:$0]  %s1686_s2, 512, %s21_s16, [#allocation3], %s1444_s25, %s1444_s25, %s1445_s26  }
  0x12   :  { %1439 = dma.done.wait [#allocation3], 512  }
  0x13   :  { %1440 = vsyncadd [#allocation3], 4294966784  ;;  %v61_v0 = vlaneseq  ;;  %v1446_v1 = vmov 0.0|0.0   ;;  %v1447_v2 = vmov 1983009808   ;;  %vm1448_vm0 = vmmov 0  }
  0x14   :  { %1272 = vmatprep.subr.bf16.mxu1 %v1446_v1  ;;  %v59_v3 = vunpack.c.l.s4 %v1447_v2  ;;  %v1449_v4 = vmov 0.0   ;;  %vm95_vm1 = vcmask 1043456   ;;  %v218_v7 = vld [vmem:[#allocation2] sm:$0xff]  ;;  %v219_v8 = vld [vmem:[#allocation2 + $0x8] sm:$0xff]  ;;  %v40_v9 = vld [vmem:[%s1685_s1] sm:$0xf] }
  0x15   :  { %1192 = vmatprep.mubr.msk.f32.mxu1 %vm1448_vm0, %v1449_v4  ;;  %v62_v6 = vshrl.u32 %v61_v0, 7  ;;  %v1499_v11 = vpack.c.bf16 %v219_v8, %v218_v7  ;;  %1179 = vmatprep.subr.msk.mxu0 %vm95_vm1, %v40_v9  ;;  %v32_v12 = vld [vmem:[%s1684_s0] sm:$0x3]  ;;  %v33_v13 = vld [vmem:[%s1684_s0 + $0x2] sm:$0x3]  ;;  %v221_v26 = vld [vmem:[#allocation2 + $0x18] sm:$0xff] }
  0x16   :  { %v60_v5 = vunpack.c.0.s8 %v59_v3  ;;  %v34_v14 = vld [vmem:[%s1684_s0 + $0x4] sm:$0x3]  ;;  %1180 = vmatpush3.msk.msra.mxu0 %vm95_vm1, %v40_v9  ;;  %v35_v15 = vld [vmem:[%s1684_s0 + $0x6] sm:$0x3]  ;;  %v56_v16 = vcombine.low %v32_v12, %v33_v13  ;;  %v36_v17 = vld [vmem:[%s1684_s0 + $0x8] sm:$0x3] }
  0x17   :  { %v37_v18 = vld [vmem:[%s1684_s0 + $0xa] sm:$0x3]  ;;  %1274 = vmatpush3.bf16.msra.mxu1 %v1499_v11  ;;  %v57_v19 = vcombine.low %v34_v14, %v35_v15  ;;  %v38_v20 = vld [vmem:[%s1684_s0 + $0xc] sm:$0x3]  ;;  %v39_v21 = vld [vmem:[%s1684_s0 + $0xe] sm:$0x3]  ;;  %1278 = vmatprep.subr.bf16.mxu0 %v1446_v1 }
  0x18   :  { %v1497_v10 = vsub.s32 %v60_v5, %v62_v6  ;;  %v73_v22 = vcombine.low %v36_v17, %v37_v18  ;;  %v220_v23 = vld [vmem:[#allocation2 + $0x10] sm:$0xff]  ;;  %v74_v25 = vcombine.low %v38_v20, %v39_v21  ;;  %1275 = vmatprep.subr.bf16.mxu1 %v1446_v1  ;;  %vm90_vm2 = vcmask 31744   ;;  %s1450_s20 = smov 32   ;;  %s1452_s21 = smov 96  }
  0x19   :  { %v1531_v29 = vpack.c.bf16 %v221_v26, %v220_v23  ;;  %v1117_v33 = vld [vmem:[%s1687_s3] ss:$0 sm:$0xff]  ;;  %s1451_s3 = smov 64   ;;  %vm222_vm3 = vcmask 261120   ;;  %vm658_vm4 = vcmask 523264   ;;  %vm660_vm5 = vcmask 785408  }
  0x1a   :  { %v64_v24 = vrot.slane %v56_v16, %v1497_v10  ;;  %v71_v27 = vrot.slane %v57_v19, %v1497_v10  ;;  %v81_v28 = vrot.slane %v73_v22, %v1497_v10  ;;  %v88_v30 = vrot.slane %v74_v25, %v1497_v10  ;;  %s1453_s22 = smov [#allocation5]  }
  0x1b   :  { %1277 = vmatpush3.bf16.msra.mxu1 %v1531_v29  ;;  %s1108_s23 = sshll.u32 %s1453_s22, 4  ;;  %s1109_s23 = int_to_ptr.vmem [resolvable:$true] %s1108_s23 }
  0x1c   :  { %v72_v31 = vcombine.low %v64_v24, %v71_v27  ;;  %v89_v32 = vcombine.low %v81_v28, %v88_v30  ;;  %1284 = vmatprep.subr.bf16.mxu1 %v1446_v1  ;;  %s1417_s24 = scalar_lea.vmem %s1109_s23, 64  ;;  %p1422_p9 = scmp.lt.s32.totalorder %s1109_s23, %s1109_s23 }
  0x1d   :  { %p1418_p8 = scmp.ne.s32.totalorder %s1109_s23, %s1417_s24  ;;  %p1423_p10 = scmp.lt.s32.totalorder %s1417_s24, %s1417_s24 }
  0x1e   :  { %1181 = vmatprep.mubr.msk.f32.mxu0 %vm90_vm2, %v72_v31  ;;  %1193 = vmatmul.mubr.f32.vlgmr.msra.gmra.mrb[0].mxu1 %v1449_v4 }
  0x1f   :  { %1182 = vmatmul.mubr.msk.f32.vlgmr.msra.gmra.mrb[0].mxu0 %vm90_vm2, %v89_v32  ;;  %1286 = vmatpush3.bf16.msra.mxu1 %v1499_v11  ;;  %p1424_p11 = por %p1423_p10, %p1422_p9 }
  0x20   :  { %1280 = vmatpush3.bf16.msra.mxu0 %v1499_v11  ;;  %1203 = vmatprep.mubr.msk.f32.mxu0 %vm1448_vm0, %v1449_v4 }
  0x21   :  { %1281 = vmatprep.subr.bf16.mxu0 %v1446_v1  ;;  %1287 = vmatprep.subr.bf16.mxu1 %v1446_v1  ;;  %p1425_p12 = pnand %p1424_p11, %p1418_p8 }
  0x22   :  { %1214 = vmatprep.mubr.msk.f32.mxu1 %vm1448_vm0, %v1449_v4 }
  0x23   :  { %1289 = vmatpush3.bf16.msra.mxu1 %v1531_v29 }
  0x24   :  { %1283 = vmatpush3.bf16.msra.mxu0 %v1531_v29  ;;  %1296 = vmatprep.subr.bf16.mxu1 %v1446_v1 }
  0x25   :  { %1290 = vmatprep.subr.bf16.mxu0 %v1446_v1 }
  0xf1   :  { %v292_v35 = vpop.f32.mrb[0].mxu1 }
  0xf2   :  { %v1183_v34 = vpop.f32.mrb[0].mxu0  ;;  %v1194_v38 = vpop.f32.mrb[1].mxu1 }
  0xf3   :  { %v1552_v36 = vadd.f32 %v1183_v34, %v1117_v33  ;;  %v165_v37 = vpop.f32.mrb[1].mxu0 }
  0xf4   :  { %v1554_v39 = vadd.f32 %v1117_v33, %v165_v37 }
  0xf6   :  { %v183_v40 = vrot.slane %v1554_v39, %v1497_v10  ;;  %v176_v16 = vcombine.high %v1554_v39, %v1554_v39 }
  0xf8   :  { %v296_v41 = vadd.f32 %v292_v35, %v183_v40  ;;  %v191_v57 = vcombine.high %v183_v40, %v183_v40  ;;  %v190_v17 = vrot.slane %v176_v16, %v1497_v10 }
  0xfa   :  { %1331 = vtanh.f32 %v296_v41  ;;  %v1121_v43 = vmul.f32 -1.442695, %v296_v41  ;;  %v192_v38 = vcombine.high %v190_v17, %v190_v17 }
  0xfc   :  { %1333 = vpow2.f32 %v1121_v43 }
 0x104   :  { %v1332_v42 = vpop.eup %1331 }
 0x105   :  { %306 = vrot.lane.b32.xlu0 %v1332_v42, %s1450_s20 }
 0x106   :  { %v1334_v44 = vpop.eup %1333 }
 0x107   :  { %v300_v45 = vadd.f32 1.0, %v1334_v44 }
 0x109   :  { %1335 = vrcp.f32 %v300_v45 }
 0x113   :  { %v1336_v46 = vpop.eup %1335 }
 0x114   :  { %v304_v49 = vmul.f32 0.0, %v1336_v46 }
 0x177   :  { %v307_v47 = vpop.permute.xlu0 %306 }
 0x178   :  { %v309_v48 = vmul.f32 %v1336_v46, %v307_v47 }
 0x17a   :  { %311 = vrot.lane.b32.xlu0 %v309_v48, %s1450_s20 }
 0x1ec   :  { %v312_v50 = vpop.permute.xlu0 %311 }
 0x1ed   :  { %v314_v51 = vadd.f32 %v312_v50, %v304_v49 }
 0x1ef   :  { %1337 = vtanh.f32 %v314_v51 }
 0x1f9   :  { %v1338_v52 = vpop.eup %1337 }
 0x1fa   :  { %317 = vrot.lane.b32.xlu1 %v1338_v52, %s1450_s20 }
 0x26c   :  { %v318_v53 = vpop.permute.xlu1 %317 }
 0x26d   :  { %v320_v54 = vmul.f32 %v1336_v46, %v318_v53 }
 0x26f   :  { %v328_v55 = vrot.slane %v320_v54, %v1497_v10 }
 0x271   :  { %329 = vrot.lane.b32.xlu1 %v328_v55, %s1451_s3 }
 0x2e3   :  { %v1563_v56 = vpop.permute.xlu1 %329 }
 0x2e4   :  { %1204 = vmatmul.mubr.msk.f32.vlgmr.msra.gmra.mrb[2].mxu0 %vm222_vm3, %v1563_v56 }
 0x2e5   :  { %1292 = vmatpush3.bf16.msra.mxu0 %v1499_v11  ;;  %1225 = vmatprep.mubr.msk.f32.mxu0 %vm1448_vm0, %v1449_v4 }
 0x2e6   :  { %1293 = vmatprep.subr.bf16.mxu0 %v1446_v1 }
 0x2e9   :  { %1295 = vmatpush3.bf16.msra.mxu0 %v1531_v29 }
 0x2ea   :  { %1302 = vmatprep.subr.bf16.mxu0 %v1446_v1 }
 0x3b7   :  { %v399_v58 = vpop.f32.mrb[2].mxu0 }
 0x3b8   :  { %v403_v59 = vadd.f32 %v399_v58, %v191_v57  ;;  %v1205_v60 = vpop.f32.mrb[3].mxu0  ;;  %v200_v58 = vrot.slane %v1552_v36, %v1497_v10 }
 0x3ba   :  { %1339 = vtanh.f32 %v403_v59  ;;  %v1123_v62 = vmul.f32 -1.442695, %v403_v59 }
 0x3bc   :  { %1341 = vpow2.f32 %v1123_v62 }
 0x3c4   :  { %v1340_v61 = vpop.eup %1339 }
 0x3c5   :  { %413 = vrot.lane.b32.xlu0 %v1340_v61, %s1450_s20 }
 0x3c6   :  { %v1342_v63 = vpop.eup %1341 }
 0x3c7   :  { %v407_v0 = vadd.f32 1.0, %v1342_v63 }
 0x3c9   :  { %1343 = vrcp.f32 %v407_v0 }
 0x3d3   :  { %v1344_v2 = vpop.eup %1343 }
 0x3d4   :  { %v411_v6 = vmul.f32 %v1344_v2, %v314_v51 }
 0x437   :  { %v414_v3 = vpop.permute.xlu0 %413 }
 0x438   :  { %v416_v5 = vmul.f32 %v1344_v2, %v414_v3 }
 0x43a   :  { %418 = vrot.lane.b32.xlu1 %v416_v5, %s1450_s20 }
 0x4ac   :  { %v419_v7 = vpop.permute.xlu1 %418 }
 0x4ad   :  { %v421_v8 = vadd.f32 %v419_v7, %v411_v6 }
 0x4af   :  { %1345 = vtanh.f32 %v421_v8 }
 0x4b9   :  { %v1346_v9 = vpop.eup %1345 }
 0x4ba   :  { %424 = vrot.lane.b32.xlu0 %v1346_v9, %s1450_s20 }
 0x52c   :  { %v425_v12 = vpop.permute.xlu0 %424 }
 0x52d   :  { %v427_v13 = vmul.f32 %v1344_v2, %v425_v12 }
 0x52f   :  { %v1577_v14 = vrot.slane %v427_v13, %v1497_v10 }
 0x531   :  { %436 = vrot.lane.b32.xlu1 %v1577_v14, %s1451_s3 }
 0x5a3   :  { %v437_v15 = vpop.permute.xlu1 %436 }
 0x5a4   :  { %1215 = vmatmul.mubr.msk.f32.vlgmr.msra.gmra.mrb[2].mxu1 %vm222_vm3, %v437_v15 }
 0x5a5   :  { %1298 = vmatpush3.bf16.msra.mxu1 %v1499_v11  ;;  %1236 = vmatprep.mubr.msk.f32.mxu1 %vm1448_vm0, %v1449_v4 }
 0x5a6   :  { %1299 = vmatprep.subr.bf16.mxu1 %v1446_v1 }
 0x5a9   :  { %1301 = vmatpush3.bf16.msra.mxu1 %v1531_v29 }
 0x5aa   :  { %1308 = vmatprep.subr.bf16.mxu1 %v1446_v1 }
 0x677   :  { %v506_v18 = vpop.f32.mrb[2].mxu1 }
 0x678   :  { %v510_v19 = vadd.f32 %v506_v18, %v190_v17  ;;  %v1216_v20 = vpop.f32.mrb[3].mxu1  ;;  %v208_v18 = vcombine.high %v200_v58, %v200_v58 }
 0x67a   :  { %1347 = vtanh.f32 %v510_v19  ;;  %v1125_v22 = vmul.f32 -1.442695, %v510_v19 }
 0x67c   :  { %1349 = vpow2.f32 %v1125_v22 }
 0x684   :  { %v1348_v21 = vpop.eup %1347 }
 0x685   :  { %520 = vrot.lane.b32.xlu0 %v1348_v21, %s1450_s20 }
 0x686   :  { %v1350_v23 = vpop.eup %1349 }
 0x687   :  { %v514_v24 = vadd.f32 1.0, %v1350_v23 }
 0x689   :  { %1351 = vrcp.f32 %v514_v24 }
 0x693   :  { %v1352_v25 = vpop.eup %1351 }
 0x694   :  { %v518_v28 = vmul.f32 %v1352_v25, %v421_v8 }
 0x6f7   :  { %v521_v26 = vpop.permute.xlu0 %520 }
 0x6f8   :  { %v523_v27 = vmul.f32 %v1352_v25, %v521_v26 }
 0x6fa   :  { %525 = vrot.lane.b32.xlu1 %v523_v27, %s1450_s20 }
 0x76c   :  { %v526_v30 = vpop.permute.xlu1 %525 }
 0x76d   :  { %v528_v31 = vadd.f32 %v526_v30, %v518_v28 }
 0x76f   :  { %1353 = vtanh.f32 %v528_v31 }
 0x779   :  { %v1354_v32 = vpop.eup %1353 }
 0x77a   :  { %531 = vrot.lane.b32.xlu0 %v1354_v32, %s1450_s20 }
 0x7ec   :  { %v532_v33 = vpop.permute.xlu0 %531 }
 0x7ed   :  { %v1594_v34 = vmul.f32 %v1352_v25, %v532_v33 }
 0x7ef   :  { %v542_v35 = vrot.slane %v1594_v34, %v1497_v10 }
 0x7f1   :  { %543 = vrot.lane.b32.xlu1 %v542_v35, %s1451_s3  ;;  %v193_v35 = vcombine.high %v1552_v36, %v1552_v36 }
 0x863   :  { %v544_v37 = vpop.permute.xlu1 %543 }
 0x864   :  { %1226 = vmatmul.mubr.msk.f32.vlgmr.msra.gmra.mrb[4].mxu0 %vm222_vm3, %v544_v37  ;;  %v207_v37 = vrot.slane %v193_v35, %v1497_v10 }
 0x865   :  { %1304 = vmatpush3.bf16.msra.mxu0 %v1499_v11  ;;  %1247 = vmatprep.mubr.msk.f32.mxu0 %vm1448_vm0, %v1449_v4 }
 0x866   :  { %1305 = vmatprep.subr.bf16.mxu0 %v1446_v1 }
 0x869   :  { %1307 = vmatpush3.bf16.msra.mxu0 %v1531_v29 }
 0x86a   :  { %1314 = vmatprep.subr.bf16.mxu0 %v1446_v1 }
 0x937   :  { %v613_v39 = vpop.f32.mrb[4].mxu0 }
 0x938   :  { %v617_v40 = vadd.f32 %v613_v39, %v192_v38  ;;  %v1227_v41 = vpop.f32.mrb[5].mxu0 }
 0x93a   :  { %1355 = vtanh.f32 %v617_v40  ;;  %v1127_v43 = vmul.f32 -1.442695, %v617_v40 }
 0x93c   :  { %1357 = vpow2.f32 %v1127_v43 }
 0x944   :  { %v1356_v42 = vpop.eup %1355 }
 0x945   :  { %627 = vrot.lane.b32.xlu0 %v1356_v42, %s1450_s20 }
 0x946   :  { %v1358_v44 = vpop.eup %1357 }
 0x947   :  { %v621_v45 = vadd.f32 1.0, %v1358_v44 }
 0x949   :  { %1359 = vrcp.f32 %v621_v45 }
 0x953   :  { %v1360_v46 = vpop.eup %1359 }
 0x954   :  { %v625_v49 = vmul.f32 %v1360_v46, %v528_v31 }
 0x9b7   :  { %v628_v47 = vpop.permute.xlu0 %627 }
 0x9b8   :  { %v630_v48 = vmul.f32 %v1360_v46, %v628_v47 }
 0x9ba   :  { %632 = vrot.lane.b32.xlu1 %v630_v48, %s1450_s20 }
 0xa2c   :  { %v633_v50 = vpop.permute.xlu1 %632 }
 0xa2d   :  { %v635_v51 = vadd.f32 %v633_v50, %v625_v49 }
 0xa2f   :  { %1361 = vtanh.f32 %v635_v51 }
 0xa39   :  { %v1362_v52 = vpop.eup %1361 }
 0xa3a   :  { %638 = vrot.lane.b32.xlu0 %v1362_v52, %s1450_s20 }
 0xaac   :  { %v639_v53 = vpop.permute.xlu0 %638 }
 0xaad   :  { %v641_v54 = vmul.f32 %v1360_v46, %v639_v53 }
 0xaaf   :  { %v1610_v55 = vrot.slane %v641_v54, %v1497_v10 }
 0xab1   :  { %663 = vrot.lane.b32.xlu1 %v1610_v55, %s1451_s3 }
 0xb23   :  { %v664_v57 = vpop.permute.xlu1 %663 }
 0xb24   :  { %1237 = vmatmul.mubr.msk.f32.vlgmr.msra.gmra.mrb[4].mxu1 %vm222_vm3, %v664_v57  ;;  %v209_v57 = vcombine.high %v207_v37, %v207_v37 }
 0xb25   :  { %1310 = vmatpush3.bf16.msra.mxu1 %v1499_v11  ;;  %1258 = vmatprep.mubr.msk.f32.mxu1 %vm1448_vm0, %v1449_v4 }
 0xb26   :  { %1311 = vmatprep.subr.bf16.mxu1 %v1446_v1 }
 0xb29   :  { %1313 = vmatpush3.bf16.msra.mxu1 %v1531_v29 }
 0xbf7   :  { %v733_v59 = vpop.f32.mrb[4].mxu1 }
 0xbf8   :  { %v737_v60 = vadd.f32 %v733_v59, %v200_v58  ;;  %v1238_v61 = vpop.f32.mrb[5].mxu1 }
 0xbfa   :  { %1363 = vtanh.f32 %v737_v60  ;;  %v1129_v63 = vmul.f32 -1.442695, %v737_v60 }
 0xbfc   :  { %1365 = vpow2.f32 %v1129_v63 }
 0xc04   :  { %v1364_v62 = vpop.eup %1363 }
 0xc05   :  { %747 = vrot.lane.b32.xlu0 %v1364_v62, %s1450_s20 }
 0xc06   :  { %v1366_v0 = vpop.eup %1365 }
 0xc07   :  { %v741_v2 = vadd.f32 1.0, %v1366_v0 }
 0xc09   :  { %1367 = vrcp.f32 %v741_v2 }
 0xc13   :  { %v1368_v3 = vpop.eup %1367 }
 0xc14   :  { %v745_v7 = vmul.f32 %v1368_v3, %v635_v51 }
 0xc77   :  { %v748_v5 = vpop.permute.xlu0 %747 }
 0xc78   :  { %v750_v6 = vmul.f32 %v1368_v3, %v748_v5 }
 0xc7a   :  { %752 = vrot.lane.b32.xlu1 %v750_v6, %s1450_s20 }
 0xcec   :  { %v753_v8 = vpop.permute.xlu1 %752 }
 0xced   :  { %v755_v9 = vadd.f32 %v753_v8, %v745_v7 }
 0xcef   :  { %1369 = vtanh.f32 %v755_v9 }
 0xcf9   :  { %v1370_v12 = vpop.eup %1369 }
 0xcfa   :  { %758 = vrot.lane.b32.xlu0 %v1370_v12, %s1450_s20 }
 0xd6c   :  { %v759_v13 = vpop.permute.xlu0 %758 }
 0xd6d   :  { %v761_v15 = vmul.f32 %v1368_v3, %v759_v13 }
 0xd6f   :  { %v769_v16 = vrot.slane %v761_v15, %v1497_v10 }
 0xd71   :  { %770 = vrot.lane.b32.xlu1 %v769_v16, %s1451_s3 }
 0xde3   :  { %v1627_v17 = vpop.permute.xlu1 %770 }
 0xde4   :  { %1248 = vmatmul.mubr.msk.f32.vlgmr.msra.gmra.mrb[6].mxu0 %vm222_vm3, %v1627_v17 }
 0xde5   :  { %1316 = vmatpush3.bf16.msra.mxu0 %v1499_v11  ;;  %1269 = vmatprep.mubr.msk.f32.mxu0 %vm1448_vm0, %v1449_v4 }
 0xde6   :  { %1317 = vmatprep.subr.bf16.mxu0 %v1446_v1 }
 0xde9   :  { %1319 = vmatpush3.bf16.msra.mxu0 %v1531_v29 }
 0xeb7   :  { %v840_v19 = vpop.f32.mrb[6].mxu0 }
 0xeb8   :  { %v844_v20 = vadd.f32 %v840_v19, %v208_v18  ;;  %v1249_v21 = vpop.f32.mrb[7].mxu0 }
 0xeba   :  { %1371 = vtanh.f32 %v844_v20  ;;  %v1131_v23 = vmul.f32 -1.442695, %v844_v20 }
 0xebc   :  { %1373 = vpow2.f32 %v1131_v23 }
 0xec4   :  { %v1372_v22 = vpop.eup %1371 }
 0xec5   :  { %854 = vrot.lane.b32.xlu0 %v1372_v22, %s1450_s20 }
 0xec6   :  { %v1374_v24 = vpop.eup %1373 }
 0xec7   :  { %v848_v25 = vadd.f32 1.0, %v1374_v24 }
 0xec9   :  { %1375 = vrcp.f32 %v848_v25 }
 0xed3   :  { %v1376_v11 = vpop.eup %1375 }
 0xed4   :  { %v852_v1 = vmul.f32 %v1376_v11, %v755_v9 }
 0xf37   :  { %v855_v26 = vpop.permute.xlu0 %854 }
 0xf38   :  { %v857_v4 = vmul.f32 %v1376_v11, %v855_v26 }
 0xf3a   :  { %859 = vrot.lane.b32.xlu1 %v857_v4, %s1450_s20 }
 0xfac   :  { %v860_v29 = vpop.permute.xlu1 %859 }
 0xfad   :  { %v862_v27 = vadd.f32 %v860_v29, %v852_v1 }
 0xfaf   :  { %1377 = vtanh.f32 %v862_v27 }
 0xfb9   :  { %v1378_v28 = vpop.eup %1377 }
 0xfba   :  { %865 = vrot.lane.b32.xlu0 %v1378_v28, %s1450_s20 }
0x102c   :  { %v866_v30 = vpop.permute.xlu0 %865 }
0x102d   :  { %v868_v31 = vmul.f32 %v1376_v11, %v866_v30 }
0x102f   :  { %v1640_v32 = vrot.slane %v868_v31, %v1497_v10 }
0x1031   :  { %877 = vrot.lane.b32.xlu1 %v1640_v32, %s1451_s3 }
0x10a3   :  { %v878_v33 = vpop.permute.xlu1 %877 }
0x10a4   :  { %1259 = vmatmul.mubr.msk.f32.vlgmr.msra.gmra.mrb[6].mxu1 %vm222_vm3, %v878_v33 }
0x1177   :  { %v947_v38 = vpop.f32.mrb[6].mxu1 }
0x1178   :  { %v951_v39 = vadd.f32 %v947_v38, %v207_v37  ;;  %v1260_v40 = vpop.f32.mrb[7].mxu1 }
0x117a   :  { %1379 = vtanh.f32 %v951_v39  ;;  %v1133_v42 = vmul.f32 -1.442695, %v951_v39 }
0x117c   :  { %1381 = vpow2.f32 %v1133_v42 }
0x1184   :  { %v1380_v41 = vpop.eup %1379 }
0x1185   :  { %961 = vrot.lane.b32.xlu0 %v1380_v41, %s1450_s20 }
0x1186   :  { %v1382_v43 = vpop.eup %1381 }
0x1187   :  { %v955_v44 = vadd.f32 1.0, %v1382_v43 }
0x1189   :  { %1383 = vrcp.f32 %v955_v44 }
0x1193   :  { %v1384_v45 = vpop.eup %1383 }
0x1194   :  { %v959_v36 = vmul.f32 %v1384_v45, %v862_v27 }
0x11f7   :  { %v962_v46 = vpop.permute.xlu0 %961 }
0x11f8   :  { %v964_v47 = vmul.f32 %v1384_v45, %v962_v46 }
0x11fa   :  { %966 = vrot.lane.b32.xlu1 %v964_v47, %s1450_s20 }
0x126c   :  { %v967_v48 = vpop.permute.xlu1 %966 }
0x126d   :  { %v969_v49 = vadd.f32 %v967_v48, %v959_v36 }
0x126f   :  { %1385 = vtanh.f32 %v969_v49 }
0x1279   :  { %v1386_v50 = vpop.eup %1385 }
0x127a   :  { %972 = vrot.lane.b32.xlu0 %v1386_v50, %s1450_s20 }
0x12ec   :  { %v973_v51 = vpop.permute.xlu0 %972 }
0x12ed   :  { %v975_v52 = vmul.f32 %v1384_v45, %v973_v51 }
0x12ef   :  { %v983_v53 = vrot.slane %v975_v52, %v1497_v10 }
0x12f1   :  { %984 = vrot.lane.b32.xlu1 %v983_v53, %s1451_s3 }
0x1363   :  { %v985_v54 = vpop.permute.xlu1 %984 }
0x1364   :  { %1270 = vmatmul.mubr.msk.f32.vlgmr.msra.gmra.mrb[8].mxu0 %vm222_vm3, %v985_v54 }
0x1437   :  { %v1054_v58 = vpop.f32.mrb[8].mxu0 }
0x1438   :  { %v1058_v59 = vadd.f32 %v1054_v58, %v209_v57  ;;  %v1271_v60 = vpop.f32.mrb[9].mxu0 }
0x143a   :  { %1387 = vtanh.f32 %v1058_v59  ;;  %v1135_v62 = vmul.f32 -1.442695, %v1058_v59 }
0x143c   :  { %1389 = vpow2.f32 %v1135_v62 }
0x1444   :  { %v1388_v61 = vpop.eup %1387 }
0x1445   :  { %1068 = vrot.lane.b32.xlu0 %v1388_v61, %s1450_s20 }
0x1446   :  { %v1390_v63 = vpop.eup %1389 }
0x1447   :  { %v1062_v0 = vadd.f32 1.0, %v1390_v63 }
0x1449   :  { %1391 = vrcp.f32 %v1062_v0 }
0x1453   :  { %v1392_v2 = vpop.eup %1391 }
0x1454   :  { %v1066_v6 = vmul.f32 %v1392_v2, %v969_v49 }
0x14b7   :  { %v1069_v3 = vpop.permute.xlu0 %1068 }
0x14b8   :  { %v1071_v5 = vmul.f32 %v1392_v2, %v1069_v3 }
0x14ba   :  { %1073 = vrot.lane.b32.xlu1 %v1071_v5, %s1450_s20 }
0x14be   :  { %643 = vrot.lane.b32.xlu1 %v1577_v14, %s1452_s21 }
0x14c2   :  { %654 = vrot.lane.b32.xlu1 %v1610_v55, %s1450_s20 }
0x152c   :  { %v1074_v7 = vpop.permute.xlu1 %1073 }
0x152d   :  { %v1076_v8 = vadd.f32 %v1074_v7, %v1066_v6 }
0x152f   :  { %1393 = vtanh.f32 %v1076_v8 }
0x1530   :  { %v644_v9 = vpop.permute.xlu1 %643 }
0x1531   :  { %v657_v12 = vsel %vm222_vm3, %v1563_v56, %v644_v9 }
0x1532   :  { %v659_v13 = vsel %vm658_vm4, %v657_v12, %v1594_v34 }
0x1534   :  { %v655_v15 = vpop.permute.xlu1 %654 }
0x1535   :  { %v661_v16 = vsel %vm660_vm5, %v659_v13, %v655_v15 }
0x1536   :  { %662 = vst [vmem:[#allocation5] sm:$0x3] %v661_v16 }
0x1539   :  { %v1394_v14 = vpop.eup %1393 }
0x153a   :  { %1079 = vrot.lane.b32.xlu0 %v1394_v14, %s1450_s20 }
0x153e   :  { %1084 = vrot.lane.b32.xlu0 %v1640_v32, %s1452_s21 }
0x15ac   :  { %v1080_v55 = vpop.permute.xlu0 %1079 }
0x15ad   :  { %v1082_v18 = vmul.f32 %v1392_v2, %v1080_v55 }
0x15af   :  { %v1094_v19 = vrot.slane %v1082_v18, %v1497_v10 }
0x15b0   :  { %v1085_v56 = vpop.permute.xlu0 %1084 }
0x15b1   :  { %1095 = vrot.lane.b32.xlu0 %v1094_v19, %s1450_s20  ;;  %v1098_v20 = vsel %vm222_vm3, %v1627_v17, %v1085_v56 }
0x15b2   :  { %v1099_v34 = vsel %vm658_vm4, %v1098_v20, %v975_v52 }
0x1623   :  { %v1096_v21 = vpop.permute.xlu0 %1095 }
0x1624   :  { %v1100_v22 = vsel %vm660_vm5, %v1099_v34, %v1096_v21 }
0x1625   :  { %1101 = vst [vmem:[#allocation5 + $0x2] sm:$0x3] %v1100_v22 }
0x1626   :  { %1428 = shalt.err (!%p1425_p12)
}
0x1627   :  { %s1429_s27 = scalar_lea.hbm %s1688_s4, 64 }
0x1628   :  { %p1430_p13 = scmp.ne.s32.totalorder %s1688_s4, %s1429_s27  ;;  %p1433_p0 = scmp.lt.u32.totalorder %s1429_s27, %s1688_s4 }
0x162a   :  { %p1435_p1 = pnand %p1433_p0, %p1430_p13 }
0x162c   :  { %1438 = shalt.err (!%p1435_p1)
}
0x162d   :  { %1111 = dma.vmem_to_hbm [thread:$0]  %s1109_s23, 64, %s1688_s4, [#allocation4]  }
0x162e   :  { %1441 = dma.done.wait [#allocation4], 64  }
0x162f   :  { %1442 = vsyncadd [#allocation4], 4294967232 }
0x1630   :  { %1115 = vsyncpa [#allocation3], 1 }
0x1631   :  { %1116 = vsyncpa [#allocation4], 1 }

</bundles_post_ra>
